<compile_context>
chip_gen: v5e
topology: v5e:2x2
jax: 0.10.0
libtpu: 0.0.40
codegen_flags: <defaults>
</compile_context>

<pallas_src>
import functools

import jax
import jax.numpy as jnp
from jax import lax
from jax.experimental import pallas as pl
from jax.experimental.pallas import tpu as pltpu


# ---------------------------------------------------------------------------
# Pallas kernel: in-VMEM conv (KH row-GEMMs) + bias + activation epilogue
# ---------------------------------------------------------------------------
def _make_conv_epilogue_kernel(n_batch, h_in, oh, kh_taps, flag):
    """Kernel over full-array VMEM blocks; n_batch/kh loops unrolled at trace."""

    def kernel(x_ref, wt_ref, b_ref, o_ref):
        bias = b_ref[...]                                    # (1, OCP) f32, hoisted
        for n in range(n_batch):                             # N == 2, unrolled
            acc = jnp.zeros((oh, o_ref.shape[1]), jnp.float32)
            for kh in range(kh_taps):                        # KH == 3, unrolled
                # rows [oh + kh] of image n, all (w, c) columns: (OH, W*C)
                lhs = x_ref[n * h_in + kh: n * h_in + kh + oh, :]
                acc = acc + jnp.dot(lhs.astype(jnp.bfloat16), wt_ref[kh],
                                    preferred_element_type=jnp.float32)
            y = acc + bias
            if flag:
                out = jnp.maximum(y, 0.0)                    # relu(conv(x))
            else:
                out = jnp.where(y > 0.0, 2.0 * y, y)         # relu(conv(x)) + conv(x)
            o_ref[n * oh:(n + 1) * oh, :] = out

    return kernel


# ---------------------------------------------------------------------------
# Wrapper: cheap layout prep + single pallas_call
# ---------------------------------------------------------------------------
def bad_fx_model_forward(x_nchw, weight, bias, flag=False):
    """Equivalent of BadFxModel.forward.

    x_nchw: (N, C, H, W) float32
    weight: (OC, C, KH, KW) float32   (PyTorch Conv2d weight layout)
    bias:   (OC,) float32
    """
    N, C, H, W = x_nchw.shape
    OC, Cw, KH, KW = weight.shape
    assert C == Cw
    OH, OW = H - KH + 1, W - KW + 1          # stride 1, no padding (Conv2d(3,5,3))
    OCW = OW * OC                            # flattened (ow, oc) output width
    OCP = ((OCW + 127) // 128) * 128         # lane-dense output slab width

    # ---- activation-side prep: just a layout view of the ~6 KiB input -----
    x2d = x_nchw.transpose(0, 2, 3, 1).reshape(N * H, W * C)       # (N*H, W*C) f32

    # ---- weight-side prep (precomputable at init): per-kh Toeplitz --------
    # Wt[kh, (ow+kw)*C + c, ow*OC + oc] == weight[oc, c, kh, kw]
    blk = weight.transpose(2, 3, 1, 0).reshape(KH, KW * C, OC)     # (KH, KW*C, OC)
    Wt = jnp.zeros((KH, W * C, OCP), jnp.float32)
    for ow in range(OW):
        Wt = Wt.at[:, ow * C:ow * C + KW * C, ow * OC:ow * OC + OC].set(blk)
    Wt = Wt.astype(jnp.bfloat16)                                   # bf16 MXU operand
    b_big = jnp.zeros((1, OCP), jnp.float32).at[0, :OCW].set(jnp.tile(bias, OW))

    kernel = _make_conv_epilogue_kernel(N, H, OH, KH, flag)

    flops = 2 * (N * OH * OW) * (C * KH * KW) * OC
    bytes_accessed = (x2d.size * 4 + Wt.size * 2 + b_big.size * 4
                      + (N * OH) * OCP * 4)

    out2d = pl.pallas_call(
        kernel,
        out_shape=jax.ShapeDtypeStruct((N * OH, OCP), jnp.float32),
        grid=(1,),                                                  # single step
        in_specs=[
            pl.BlockSpec((N * H, W * C), lambda i: (0, 0)),         # image rows
            pl.BlockSpec((KH, W * C, OCP), lambda i: (0, 0, 0)),    # Toeplitz weights
            pl.BlockSpec((1, OCP), lambda i: (0, 0)),               # bias
        ],
        out_specs=pl.BlockSpec((N * OH, OCP), lambda i: (0, 0)),
        compiler_params=pltpu.CompilerParams(
            dimension_semantics=("arbitrary",)),
        cost_estimate=pl.CostEstimate(
            flops=flops, transcendentals=0, bytes_accessed=bytes_accessed),
    )(x2d, Wt, b_big)

    # ---- un-flatten back to NCHW (glue, ~8 KiB) ----------------------------
    out = out2d[:, :OCW].reshape(N, OH, OW, OC).transpose(0, 3, 1, 2)
    return out


# ---------------------------------------------------------------------------
# Reference (pure JAX) for a sanity check
# ---------------------------------------------------------------------------
def _reference_forward(x_nchw, weight, bias, flag=False):
    y = lax.conv_general_dilated(
        x_nchw, weight, window_strides=(1, 1), padding="VALID",
        dimension_numbers=("NCHW", "OIHW", "NCHW"))
    y = y + bias[None, :, None, None]
    if flag:
        return jnp.maximum(y, 0.0)
    return jnp.maximum(y, 0.0) + y


if __name__ == "__main__":
    # Deterministic parameters / inputs (no checkpoint loading).
    key = jax.random.PRNGKey(0)
    k_x, k_w, k_b = jax.random.split(key, 3)

    N, C, H, W = 2, 3, 16, 16
    OC, KH, KW = 5, 3, 3

    x = jax.random.normal(k_x, (N, C, H, W), dtype=jnp.float32)
    # Mimic Conv2d default init scale (uniform in +/- 1/sqrt(fan_in)).
    fan_in = C * KH * KW
    bound = 1.0 / (fan_in ** 0.5)
    weight = jax.random.uniform(k_w, (OC, C, KH, KW), jnp.float32, -bound, bound)
    bias = jax.random.uniform(k_b, (OC,), jnp.float32, -bound, bound)

    fwd = jax.jit(bad_fx_model_forward, static_argnames=("flag",))

    for flag in (False, True):
        out = jax.block_until_ready(fwd(x, weight, bias, flag=flag))
        ref = _reference_forward(x, weight, bias, flag=flag)
        assert out.shape == (N, OC, H - KH + 1, W - KW + 1)
        # bf16 MXU operands (f32 accumulation) -> relaxed tolerance.
        assert jnp.allclose(out, ref, rtol=2e-2, atol=2e-2), f"mismatch flag={flag}"

    print("KERNEL_OK")
</pallas_src>

<mosaic_0001>
module attributes {stable_mosaic.version = 11 : i64} {
  func.func @kernel(%arg0: i32, %arg1: memref<32x48xf32, #tpu.memory_space<vmem>>, %arg2: memref<3x48x128xbf16, #tpu.memory_space<vmem>>, %arg3: memref<1x128xf32, #tpu.memory_space<vmem>>, %arg4: memref<28x128xf32, #tpu.memory_space<vmem>>) attributes {dimension_semantics = [#tpu.dimension_semantics<arbitrary>], iteration_bounds = array<i64: 1>, scalar_prefetch = 0 : i64, scratch_operands = 0 : i64, tpu.core_type = #tpu.core_type<tc>, window_params = [{pipeline_mode = #tpu.pipeline_mode<synchronous>, transform_indices = @transform_0, window_bounds = array<i64: 32, 48>}, {pipeline_mode = #tpu.pipeline_mode<synchronous>, transform_indices = @transform_1, window_bounds = array<i64: 3, 48, 128>}, {pipeline_mode = #tpu.pipeline_mode<synchronous>, transform_indices = @transform_2, window_bounds = array<i64: 1, 128>}, {pipeline_mode = #tpu.pipeline_mode<synchronous>, transform_indices = @transform_3, window_bounds = array<i64: 28, 128>}]} {
    %c0 = arith.constant 0 : index
    %c0_0 = arith.constant 0 : index
    %0 = vector.load %arg3[%c0, %c0_0] : memref<1x128xf32, #tpu.memory_space<vmem>>, vector<1x128xf32>
    %cst = arith.constant 0.000000e+00 : f32
    %1 = vector.broadcast %cst : f32 to vector<14x128xf32>
    %c0_1 = arith.constant 0 : index
    %c0_2 = arith.constant 0 : index
    %2 = vector.load %arg1[%c0_1, %c0_2] : memref<32x48xf32, #tpu.memory_space<vmem>>, vector<14x48xf32>
    %3 = arith.truncf %2 : vector<14x48xf32> to vector<14x48xbf16>
    %c0_3 = arith.constant 0 : index
    %c0_4 = arith.constant 0 : index
    %c0_5 = arith.constant 0 : index
    %4 = vector.load %arg2[%c0_3, %c0_4, %c0_5] : memref<3x48x128xbf16, #tpu.memory_space<vmem>>, vector<1x48x128xbf16>
    %5 = vector.shape_cast %4 : vector<1x48x128xbf16> to vector<48x128xbf16>
    %cst_6 = arith.constant dense<0.000000e+00> : vector<14x128xf32>
    %6 = tpu.matmul %3, %5, %cst_6 {dimension_numbers = #tpu.dot_dimension_numbers<[1], [0], [0], [1], [0, 0, 1, 1], [], []>} : vector<14x48xbf16>, vector<48x128xbf16>, vector<14x128xf32> -> vector<14x128xf32>
    %7 = arith.addf %1, %6 : vector<14x128xf32>
    %c1 = arith.constant 1 : index
    %c0_7 = arith.constant 0 : index
    %8 = vector.load %arg1[%c1, %c0_7] : memref<32x48xf32, #tpu.memory_space<vmem>>, vector<14x48xf32>
    %9 = arith.truncf %8 : vector<14x48xf32> to vector<14x48xbf16>
    %c1_8 = arith.constant 1 : index
    %c0_9 = arith.constant 0 : index
    %c0_10 = arith.constant 0 : index
    %10 = vector.load %arg2[%c1_8, %c0_9, %c0_10] : memref<3x48x128xbf16, #tpu.memory_space<vmem>>, vector<1x48x128xbf16>
    %11 = vector.shape_cast %10 : vector<1x48x128xbf16> to vector<48x128xbf16>
    %cst_11 = arith.constant dense<0.000000e+00> : vector<14x128xf32>
    %12 = tpu.matmul %9, %11, %cst_11 {dimension_numbers = #tpu.dot_dimension_numbers<[1], [0], [0], [1], [0, 0, 1, 1], [], []>} : vector<14x48xbf16>, vector<48x128xbf16>, vector<14x128xf32> -> vector<14x128xf32>
    %13 = arith.addf %7, %12 : vector<14x128xf32>
    %c2 = arith.constant 2 : index
    %c0_12 = arith.constant 0 : index
    %14 = vector.load %arg1[%c2, %c0_12] : memref<32x48xf32, #tpu.memory_space<vmem>>, vector<14x48xf32>
    %15 = arith.truncf %14 : vector<14x48xf32> to vector<14x48xbf16>
    %c2_13 = arith.constant 2 : index
    %c0_14 = arith.constant 0 : index
    %c0_15 = arith.constant 0 : index
    %16 = vector.load %arg2[%c2_13, %c0_14, %c0_15] : memref<3x48x128xbf16, #tpu.memory_space<vmem>>, vector<1x48x128xbf16>
    %17 = vector.shape_cast %16 : vector<1x48x128xbf16> to vector<48x128xbf16>
    %cst_16 = arith.constant dense<0.000000e+00> : vector<14x128xf32>
    %18 = tpu.matmul %15, %17, %cst_16 {dimension_numbers = #tpu.dot_dimension_numbers<[1], [0], [0], [1], [0, 0, 1, 1], [], []>} : vector<14x48xbf16>, vector<48x128xbf16>, vector<14x128xf32> -> vector<14x128xf32>
    %19 = arith.addf %13, %18 : vector<14x128xf32>
    %20 = vector.broadcast %0 : vector<1x128xf32> to vector<14x128xf32>
    %21 = arith.addf %19, %20 : vector<14x128xf32>
    %cst_17 = arith.constant 0.000000e+00 : f32
    %22 = vector.broadcast %cst_17 : f32 to vector<14x128xf32>
    %23 = arith.cmpf ogt, %21, %22 : vector<14x128xf32>
    %cst_18 = arith.constant 2.000000e+00 : f32
    %24 = vector.broadcast %cst_18 : f32 to vector<14x128xf32>
    %25 = arith.mulf %24, %21 : vector<14x128xf32>
    %26 = arith.select %23, %25, %21 : vector<14x128xi1>, vector<14x128xf32>
    %c0_19 = arith.constant 0 : index
    %c0_20 = arith.constant 0 : index
    %27 = vector.load %arg4[%c0_19, %c0_20] : memref<28x128xf32, #tpu.memory_space<vmem>>, vector<14x128xf32>
    tpu.vector_store %arg4[%c0_19, %c0_20], %26 {strides = array<i32>} : memref<28x128xf32, #tpu.memory_space<vmem>>, vector<14x128xf32>,
    %cst_21 = arith.constant 0.000000e+00 : f32
    %28 = vector.broadcast %cst_21 : f32 to vector<14x128xf32>
    %c16 = arith.constant 16 : index
    %c0_22 = arith.constant 0 : index
    %29 = vector.load %arg1[%c16, %c0_22] : memref<32x48xf32, #tpu.memory_space<vmem>>, vector<14x48xf32>
    %30 = arith.truncf %29 : vector<14x48xf32> to vector<14x48xbf16>
    %c0_23 = arith.constant 0 : index
    %c0_24 = arith.constant 0 : index
    %c0_25 = arith.constant 0 : index
    %31 = vector.load %arg2[%c0_23, %c0_24, %c0_25] : memref<3x48x128xbf16, #tpu.memory_space<vmem>>, vector<1x48x128xbf16>
    %32 = vector.shape_cast %31 : vector<1x48x128xbf16> to vector<48x128xbf16>
    %cst_26 = arith.constant dense<0.000000e+00> : vector<14x128xf32>
    %33 = tpu.matmul %30, %32, %cst_26 {dimension_numbers = #tpu.dot_dimension_numbers<[1], [0], [0], [1], [0, 0, 1, 1], [], []>} : vector<14x48xbf16>, vector<48x128xbf16>, vector<14x128xf32> -> vector<14x128xf32>
    %34 = arith.addf %28, %33 : vector<14x128xf32>
    %c17 = arith.constant 17 : index
    %c0_27 = arith.constant 0 : index
    %35 = vector.load %arg1[%c17, %c0_27] : memref<32x48xf32, #tpu.memory_space<vmem>>, vector<14x48xf32>
    %36 = arith.truncf %35 : vector<14x48xf32> to vector<14x48xbf16>
    %c1_28 = arith.constant 1 : index
    %c0_29 = arith.constant 0 : index
    %c0_30 = arith.constant 0 : index
    %37 = vector.load %arg2[%c1_28, %c0_29, %c0_30] : memref<3x48x128xbf16, #tpu.memory_space<vmem>>, vector<1x48x128xbf16>
    %38 = vector.shape_cast %37 : vector<1x48x128xbf16> to vector<48x128xbf16>
    %cst_31 = arith.constant dense<0.000000e+00> : vector<14x128xf32>
    %39 = tpu.matmul %36, %38, %cst_31 {dimension_numbers = #tpu.dot_dimension_numbers<[1], [0], [0], [1], [0, 0, 1, 1], [], []>} : vector<14x48xbf16>, vector<48x128xbf16>, vector<14x128xf32> -> vector<14x128xf32>
    %40 = arith.addf %34, %39 : vector<14x128xf32>
    %c18 = arith.constant 18 : index
    %c0_32 = arith.constant 0 : index
    %41 = vector.load %arg1[%c18, %c0_32] : memref<32x48xf32, #tpu.memory_space<vmem>>, vector<14x48xf32>
    %42 = arith.truncf %41 : vector<14x48xf32> to vector<14x48xbf16>
    %c2_33 = arith.constant 2 : index
    %c0_34 = arith.constant 0 : index
    %c0_35 = arith.constant 0 : index
    %43 = vector.load %arg2[%c2_33, %c0_34, %c0_35] : memref<3x48x128xbf16, #tpu.memory_space<vmem>>, vector<1x48x128xbf16>
    %44 = vector.shape_cast %43 : vector<1x48x128xbf16> to vector<48x128xbf16>
    %cst_36 = arith.constant dense<0.000000e+00> : vector<14x128xf32>
    %45 = tpu.matmul %42, %44, %cst_36 {dimension_numbers = #tpu.dot_dimension_numbers<[1], [0], [0], [1], [0, 0, 1, 1], [], []>} : vector<14x48xbf16>, vector<48x128xbf16>, vector<14x128xf32> -> vector<14x128xf32>
    %46 = arith.addf %40, %45 : vector<14x128xf32>
    %47 = vector.broadcast %0 : vector<1x128xf32> to vector<14x128xf32>
    %48 = arith.addf %46, %47 : vector<14x128xf32>
    %cst_37 = arith.constant 0.000000e+00 : f32
    %49 = vector.broadcast %cst_37 : f32 to vector<14x128xf32>
    %50 = arith.cmpf ogt, %48, %49 : vector<14x128xf32>
    %cst_38 = arith.constant 2.000000e+00 : f32
    %51 = vector.broadcast %cst_38 : f32 to vector<14x128xf32>
    %52 = arith.mulf %51, %48 : vector<14x128xf32>
    %53 = arith.select %50, %52, %48 : vector<14x128xi1>, vector<14x128xf32>
    %c14 = arith.constant 14 : index
    %c0_39 = arith.constant 0 : index
    %54 = vector.load %arg4[%c14, %c0_39] : memref<28x128xf32, #tpu.memory_space<vmem>>, vector<14x128xf32>
    tpu.vector_store %arg4[%c14, %c0_39], %53 {strides = array<i32>} : memref<28x128xf32, #tpu.memory_space<vmem>>, vector<14x128xf32>,
    return
  }
  func.func @transform_0(%arg0: i32) -> (i32, i32) {
    %c0_i32 = arith.constant 0 : i32
    %c0_i32_0 = arith.constant 0 : i32
    %c0_i32_1 = arith.constant 0 : i32
    return %c0_i32, %c0_i32_0 : i32, i32
  }
  func.func @transform_1(%arg0: i32) -> (i32, i32, i32) {
    %c0_i32 = arith.constant 0 : i32
    %c0_i32_0 = arith.constant 0 : i32
    %c0_i32_1 = arith.constant 0 : i32
    %c0_i32_2 = arith.constant 0 : i32
    return %c0_i32, %c0_i32_0, %c0_i32_1 : i32, i32, i32
  }
  func.func @transform_2(%arg0: i32) -> (i32, i32) {
    %c0_i32 = arith.constant 0 : i32
    %c0_i32_0 = arith.constant 0 : i32
    %c0_i32_1 = arith.constant 0 : i32
    return %c0_i32, %c0_i32_0 : i32, i32
  }
  func.func @transform_3(%arg0: i32) -> (i32, i32) {
    %c0_i32 = arith.constant 0 : i32
    %c0_i32_0 = arith.constant 0 : i32
    %c0_i32_1 = arith.constant 0 : i32
    return %c0_i32, %c0_i32_0 : i32, i32
  }
}

</mosaic_0001>

<bundles_post_ra>
// kernel: bad_fx_model_forward.1
= control target key start
LH: loop header
LB: loop body
LE: loop exit
PB: predicated region body
PF: predicated region fallthrough
CT: control target
= control target key end

     0   :  { %vm53_vm0 = vcmask 392192   ;;  %s566_s1 = inlined_call_operand.vmem [shape: bf16[3,48,128], index: 1, kind: input, shape index: {}]   ;;  %s567_s0 = inlined_call_operand.vmem [shape: f32[32,48], index: 0, kind: input, shape index: {}]   ;;  %s568_s2 = inlined_call_operand.vmem [shape: f32[1,128], index: 2, kind: input, shape index: {}]   ;;  %s569_s3 = inlined_call_operand.vmem [shape: f32[28,128], index: 3, kind: output, shape index: {}]  }
   0x1   :  { %v421_v0 = vld [vmem:[%s566_s1 + $0x28] sm:$0xff]  ;;  %v418_v1 = vld [vmem:[%s566_s1 + $0x10] sm:$0xff]  ;;  %v424_v2 = vld [vmem:[%s566_s1 + $0x40] sm:$0xff] }
   0x2   :  { %v430_v3 = vld [vmem:[%s566_s1 + $0x28] sm:$0xff]  ;;  %62 = vmatpush.bf16.msra.mxu0 %v421_v0  ;;  %97 = vmatpush.bf16.msra.mxu1 %v418_v1  ;;  %v420_v4 = vld [vmem:[%s566_s1 + $0x20] sm:$0xff]  ;;  %v423_v6 = vld [vmem:[%s566_s1 + $0x38] sm:$0xff] }
   0x3   :  { %v417_v5 = vld [vmem:[%s566_s1 + $0x8] sm:$0xff]  ;;  %142 = vmatpush.bf16.msra.mxu2 %v424_v2  ;;  %210 = vmatpush.bf16.msra.mxu3 %v430_v3  ;;  %v429_v7 = vld [vmem:[%s566_s1 + $0x20] sm:$0xff]  ;;  %v419_v8 = vld [vmem:[%s566_s1 + $0x18] sm:$0xff] }
   0x4   :  { %v416_v9 = vld [vmem:[%s566_s1] sm:$0xff]  ;;  %v422_v10 = vld [vmem:[%s566_s1 + $0x30] sm:$0xff]  ;;  %v428_v11 = vld [vmem:[%s566_s1 + $0x18] sm:$0xff] }
   0x5   :  { %v25_v12 = vld [vmem:[%s567_s0 + $0x1] sm:$0xff]  ;;  %v26_v13 = vld [vmem:[%s567_s0 + $0x9] sm:$0x3f]  ;;  %v175_v18 = vld [vmem:[%s567_s0 + $0x11] sm:$0xff] }
   0x6   :  { %63 = vmatpush.bf16.msra.mxu0 %v420_v4  ;;  %98 = vmatpush.bf16.msra.mxu1 %v417_v5  ;;  %v16_v14 = vld [vmem:[%s567_s0] sm:$0xff]  ;;  %v17_v15 = vld [vmem:[%s567_s0 + $0x8] sm:$0x3f]  ;;  %v176_v19 = vld [vmem:[%s567_s0 + $0x19] sm:$0x3f]  ;;  %v27_v22 = vpack.c.bf16 %v26_v13, %v25_v12 }
   0x7   :  { %v106_v16 = vld [vmem:[%s567_s0 + $0x2] sm:$0xff]  ;;  %143 = vmatpush.bf16.msra.mxu2 %v423_v6  ;;  %211 = vmatpush.bf16.msra.mxu3 %v429_v7  ;;  %v107_v17 = vld [vmem:[%s567_s0 + $0xa] sm:$0x3f]  ;;  %v427_v20 = vld [vmem:[%s566_s1 + $0x10] sm:$0xff]  ;;  %v18_v23 = vpack.c.bf16 %v17_v15, %v16_v14  ;;  %v177_v25 = vpack.c.bf16 %v176_v19, %v175_v18 }
   0x8   :  { %v433_v21 = vld [vmem:[%s566_s1 + $0x40] sm:$0xff]  ;;  %v108_v24 = vpack.c.bf16 %v107_v17, %v106_v16  ;;  %v426_v26 = vld [vmem:[%s566_s1 + $0x8] sm:$0xff]  ;;  %v432_v27 = vld [vmem:[%s566_s1 + $0x38] sm:$0xff] }
   0x9   :  { %v425_v28 = vld [vmem:[%s566_s1] sm:$0xff]  ;;  %v431_v29 = vld [vmem:[%s566_s1 + $0x30] sm:$0xff]  ;;  %v167_v31 = vld [vmem:[%s567_s0 + $0x18] sm:$0x3f] }
   0xa   :  { %64 = vmatpush.bf16.msra.mxu0 %v419_v8  ;;  %99 = vmatpush.bf16.msra.mxu1 %v416_v9  ;;  %v166_v30 = vld [vmem:[%s567_s0 + $0x10] sm:$0xff]  ;;  %v255_v33 = vld [vmem:[%s567_s0 + $0x1a] sm:$0x3f]  ;;  %v434_v39 = vld [vmem:[%s568_s2] ss:$0 sm:$0xff] }
   0xb   :  { %144 = vmatpush.bf16.msra.mxu2 %v422_v10  ;;  %212 = vmatpush.bf16.msra.mxu3 %v428_v11  ;;  %v254_v32 = vld [vmem:[%s567_s0 + $0x12] sm:$0xff]  ;;  %v168_v34 = vpack.c.bf16 %v167_v31, %v166_v30 }
   0xc   :  { %v256_v35 = vpack.c.bf16 %v255_v33, %v254_v32 }
   0xd   :  { %332 = vmatmul.msk.bf16.vlgmr.msra.gmra.mxu0 %vm53_vm0, %v27_v22  ;;  %345 = vmatmul.msk.bf16.vlgmr.msra.gmra.mxu1 %vm53_vm0, %v18_v23 }
   0xe   :  { %245 = vmatpush.bf16.msrb.mxu0 %v427_v20  ;;  %289 = vmatpush.bf16.msrb.mxu1 %v433_v21 }
   0xf   :  { %364 = vmatmul.msk.bf16.vlgmr.msra.gmra.mxu2 %vm53_vm0, %v108_v24  ;;  %383 = vmatmul.msk.bf16.vlgmr.msra.gmra.mxu3 %vm53_vm0, %v177_v25 }
  0x12   :  { %246 = vmatpush.bf16.msrb.mxu0 %v426_v26  ;;  %290 = vmatpush.bf16.msrb.mxu1 %v432_v27 }
  0x16   :  { %247 = vmatpush.bf16.msrb.mxu0 %v425_v28  ;;  %291 = vmatpush.bf16.msrb.mxu1 %v431_v29 }
  0x1d   :  { %396 = vmatmul.msk.bf16.vlgmr.msrb.gmra.mxu0 %vm53_vm0, %v168_v34  ;;  %415 = vmatmul.msk.bf16.vlgmr.msrb.gmra.mxu1 %vm53_vm0, %v256_v35 }
  0x8a   :  { %v66_v36 = vpop.f32.mrf.mxu0  ;;  %v101_v37 = vpop.f32.mrf.mxu1 }
  0x8b   :  { %v102_v38 = vadd.f32 %v101_v37, %v66_v36 }
  0x92   :  { %v146_v40 = vpop.f32.mrf.mxu2  ;;  %v68_v42 = vpop.f32.mrf.mxu0 }
  0x93   :  { %v151_v41 = vadd.f32 %v146_v40, %v102_v38  ;;  %v103_v43 = vpop.f32.mrf.mxu1  ;;  %v214_v48 = vpop.f32.mrf.mxu3 }
  0x94   :  { %v104_v47 = vadd.f32 %v103_v43, %v68_v42 }
  0x95   :  { %v156_v44 = vadd.f32 %v434_v39, %v151_v41 }
  0x97   :  { %vm158_vm1 = vcmp.gt.f32.partialorder %v156_v44, 0.0  ;;  %v160_v45 = vmul.f32 2.0, %v156_v44 }
  0x99   :  { %v162_v46 = vsel %vm158_vm1, %v160_v45, %v156_v44 }
  0x9a   :  { %164 = vst [vmem:[%s569_s3] sm:$0xff] %v162_v46  ;;  %v148_v49 = vpop.f32.mrf.mxu2  ;;  %v249_v51 = vpop.f32.mrf.mxu0 }
  0x9b   :  { %v152_v50 = vadd.f32 %v148_v49, %v104_v47  ;;  %v293_v52 = vpop.f32.mrf.mxu1  ;;  %v250_v53 = vadd.f32 %v249_v51, %v214_v48  ;;  %v216_v60 = vpop.f32.mrf.mxu3 }
  0x9d   :  { %v157_v54 = vadd.f32 %v434_v39, %v152_v50  ;;  %v298_v55 = vadd.f32 %v293_v52, %v250_v53 }
  0x9f   :  { %vm159_vm2 = vcmp.gt.f32.partialorder %v157_v54, 0.0  ;;  %v161_v56 = vmul.f32 2.0, %v157_v54  ;;  %v300_v57 = vadd.f32 %v434_v39, %v298_v55 }
  0xa1   :  { %v163_v58 = vsel %vm159_vm2, %v161_v56, %v157_v54  ;;  %vm302_vm3 = vcmp.gt.f32.partialorder %v300_v57, 0.0  ;;  %v304_v59 = vmul.f32 2.0, %v300_v57 }
  0xa2   :  { %165 = vst [vmem:[%s569_s3 + $0x8] sm:$0x3f] %v163_v58  ;;  %v251_v61 = vpop.f32.mrf.mxu0 }
  0xa3   :  { %v306_v62 = vsel %vm302_vm3, %v304_v59, %v300_v57  ;;  %v252_v63 = vadd.f32 %v251_v61, %v216_v60  ;;  %v295_v0 = vpop.f32.mrf.mxu1 }
  0xa4   :  { %308 = vst [vmem:[%s569_s3 + $0xe] sm:$0xff] %v306_v62 }
  0xa5   :  { %v299_v1 = vadd.f32 %v295_v0, %v252_v63 }
  0xa7   :  { %v301_v2 = vadd.f32 %v434_v39, %v299_v1 }
  0xa9   :  { %vm303_vm4 = vcmp.gt.f32.partialorder %v301_v2, 0.0  ;;  %v305_v3 = vmul.f32 2.0, %v301_v2 }
  0xab   :  { %v307_v4 = vsel %vm303_vm4, %v305_v3, %v301_v2 }
  0xac   :  { %309 = vst [vmem:[%s569_s3 + $0x16] sm:$0x3f] %v307_v4 }

</bundles_post_ra>
